<compile_context>
chip_gen: v7x
topology: tpu7x:2x2x1
jax: 0.10.0
libtpu: 0.0.40
codegen_flags: <defaults>
</compile_context>

<pallas_src>
import jax
import jax.numpy as jnp
import numpy as np
from jax.experimental import pallas as pl
from jax.experimental.pallas import tpu as pltpu


# ----------------------------------------------------------------------------
# Kernel
# ----------------------------------------------------------------------------
def dmf_kernel(x_ref, w1_ref, w2_ref, f1_ref, f2_ref, vecs_ref, out_ref):
    """One batch tile of the whole forward pass.

    x_ref   : [TB, F4]   bf16   concat([Y[sid], Y.T[pid], rating[sid], rating.T[pid]])
    w1_ref  : [F4, H4p]  bf16   block-diag(sw1, pw1, srw1, prw1), cols zero-padded
    w2_ref  : [H4p, D4p] bf16   block-diag(sw2, pw2, srw2, prw2), zero-padded
    f1_ref  : [D4p, D2p] bf16   final_nn linear 1, zero-padded
    f2_ref  : [D2p, Dp]  bf16   final_nn linear 2, zero-padded
    vecs_ref: [8, LANE]  f32    rows: b1|b2|fb1|fb2|fw3_row|[fb3,0..]|0|0
    out_ref : [TB, 1]    f32
    """
    mm_dt = w1_ref.dtype  # bf16 MXU operands, f32 accumulation

    # Branch layer 1 (four branches fused as one block-diagonal matmul).
    h = jnp.dot(x_ref[...], w1_ref[...], preferred_element_type=jnp.float32)
    h = jnp.maximum(h + vecs_ref[0:1, : h.shape[1]], 0.0)

    # Branch layer 2 (block-diagonal) -> already-concatenated [p|q|sr|pr].
    z = jnp.dot(h.astype(mm_dt), w2_ref[...], preferred_element_type=jnp.float32)
    z = jnp.maximum(z + vecs_ref[1:2, : z.shape[1]], 0.0)

    # final_nn linear 1 + ReLU.
    h1 = jnp.dot(z.astype(mm_dt), f1_ref[...], preferred_element_type=jnp.float32)
    h1 = jnp.maximum(h1 + vecs_ref[2:3, : h1.shape[1]], 0.0)

    # final_nn linear 2 + ReLU.
    h2 = jnp.dot(h1.astype(mm_dt), f2_ref[...], preferred_element_type=jnp.float32)
    h2 = jnp.maximum(h2 + vecs_ref[3:4, : h2.shape[1]], 0.0)

    # final_nn linear 3 ([dim,1]) as VPU multiply + lane reduce (skip N=1 MXU op).
    w3 = vecs_ref[4:5, : h2.shape[1]]
    out = jnp.sum(h2 * w3, axis=-1, keepdims=True) + vecs_ref[5:6, 0:1]
    out_ref[...] = out.astype(out_ref.dtype)


# ----------------------------------------------------------------------------
# Parameter construction / host-side repacking
# ----------------------------------------------------------------------------
def make_params(key, num_scientists, num_papers, dim, hidden_dim):
    """Deterministic synthetic parameters.  Weights stored as [in, out]."""
    def lin(k, fan_in, fan_out):
        kw, kb = jax.random.split(k)
        scale = 1.0 / np.sqrt(fan_in)
        w = jax.random.uniform(kw, (fan_in, fan_out), jnp.float32, -scale, scale)
        b = jax.random.uniform(kb, (1, fan_out), jnp.float32, -scale, scale)
        return w, b

    ks = jax.random.split(key, 11)
    sw1, sb1 = lin(ks[0], num_papers, hidden_dim)
    sw2, sb2 = lin(ks[1], hidden_dim, dim)
    pw1, pb1 = lin(ks[2], num_scientists, hidden_dim)
    pw2, pb2 = lin(ks[3], hidden_dim, dim)
    srw1, srb1 = lin(ks[4], num_papers, hidden_dim)
    srw2, srb2 = lin(ks[5], hidden_dim, dim)
    prw1, prb1 = lin(ks[6], num_scientists, hidden_dim)
    prw2, prb2 = lin(ks[7], hidden_dim, dim)
    fw1, fb1 = lin(ks[8], 4 * dim, 2 * dim)
    fw2, fb2 = lin(ks[9], 2 * dim, dim)
    fw3, fb3 = lin(ks[10], dim, 1)
    return (sw1, sb1, sw2, sb2,
            pw1, pb1, pw2, pb2,
            srw1, srb1, srw2, srb2,
            prw1, prb1, prw2, prb2,
            fw1, fb1, fw2, fb2, fw3, fb3)


def pack_fused_params(params):
    """Host-side, once: block-diag fuse the 4 branches, pad to 128 lanes,
    pack all bias rows + final weight row into one [8, LANE] f32 array."""
    (sw1, sb1, sw2, sb2,
     pw1, pb1, pw2, pb2,
     srw1, srb1, srw2, srb2,
     prw1, prb1, prw2, prb2,
     fw1, fb1, fw2, fb2, fw3, fb3) = [np.asarray(p, np.float32) for p in params]

    def rup(n, m=128):
        return ((n + m - 1) // m) * m

    def block_diag(blocks):
        rows = sum(b.shape[0] for b in blocks)
        cols = sum(b.shape[1] for b in blocks)
        out = np.zeros((rows, cols), np.float32)
        r = c = 0
        for b in blocks:
            out[r:r + b.shape[0], c:c + b.shape[1]] = b
            r += b.shape[0]
            c += b.shape[1]
        return out

    def pad_to(a, rows, cols):
        out = np.zeros((rows, cols), np.float32)
        out[: a.shape[0], : a.shape[1]] = a
        return out

    hidden_dim = sw1.shape[1]
    dim = sw2.shape[1]
    H4, D4, D2, D1 = 4 * hidden_dim, 4 * dim, 2 * dim, dim
    H4p, D4p, D2p, Dp = rup(H4), rup(D4), rup(D2), rup(D1)
    lane = max(H4p, D4p, D2p, Dp)

    # Order [scientist | paper | srating | prating] preserves the original
    # torch.cat order so fw1's input indexing stays consistent.
    W1 = block_diag([sw1, pw1, srw1, prw1])           # [2*(P+S), H4]
    W2 = block_diag([sw2, pw2, srw2, prw2])           # [H4, D4]
    W1p = pad_to(W1, W1.shape[0], H4p)
    W2p = pad_to(W2, H4p, D4p)
    F1p = pad_to(fw1, D4p, D2p)
    F2p = pad_to(fw2, D2p, Dp)

    vecs = np.zeros((8, lane), np.float32)
    vecs[0, :H4] = np.concatenate([sb1, pb1, srb1, prb1], axis=1)[0]
    vecs[1, :D4] = np.concatenate([sb2, pb2, srb2, prb2], axis=1)[0]
    vecs[2, :D2] = fb1[0]
    vecs[3, :D1] = fb2[0]
    vecs[4, :D1] = fw3[:, 0]
    vecs[5, 0] = fb3[0, 0]

    bf = lambda a: jnp.asarray(a, jnp.bfloat16)
    return (bf(W1p), bf(W2p), bf(F1p), bf(F2p), jnp.asarray(vecs, jnp.float32))


# ----------------------------------------------------------------------------
# Forward wrapper
# ----------------------------------------------------------------------------
def dmf_forward(Y, Y_T, rating, rating_T, fused, sid, pid, *, tb=16):
    """Row gathers + lane-axis concat in plain JAX; fused MLP stack in Pallas."""
    W1p, W2p, F1p, F2p, vecs = fused
    B = sid.shape[0]

    # Y_T / rating_T are precomputed once, so these are contiguous row gathers.
    x = jnp.concatenate(
        [Y[sid, :], Y_T[pid, :], rating[sid, :], rating_T[pid, :]], axis=1
    ).astype(jnp.bfloat16)                                   # [B, F4]

    b_pad = pl.cdiv(B, tb) * tb
    if b_pad != B:
        x = jnp.pad(x, ((0, b_pad - B), (0, 0)))

    F4 = x.shape[1]
    H4p, D4p = W1p.shape[1], W2p.shape[1]
    D2p, Dp = F1p.shape[1], F2p.shape[1]
    lane = vecs.shape[1]

    flops = 2 * b_pad * (F4 * H4p + H4p * D4p + D4p * D2p + D2p * Dp + Dp)
    bytes_accessed = (x.size * 2 + W1p.size * 2 + W2p.size * 2 +
                      F1p.size * 2 + F2p.size * 2 + vecs.size * 4 + b_pad * 4)

    out = pl.pallas_call(
        dmf_kernel,
        out_shape=jax.ShapeDtypeStruct((b_pad, 1), jnp.float32),
        grid_spec=pltpu.PrefetchScalarGridSpec(
            num_scalar_prefetch=0,
            grid=(b_pad // tb,),
            in_specs=[
                pl.BlockSpec((tb, F4), lambda i: (i, 0)),     # activations: tiled on batch
                pl.BlockSpec((F4, H4p), lambda i: (0, 0)),    # weights: VMEM-resident
                pl.BlockSpec((H4p, D4p), lambda i: (0, 0)),
                pl.BlockSpec((D4p, D2p), lambda i: (0, 0)),
                pl.BlockSpec((D2p, Dp), lambda i: (0, 0)),
                pl.BlockSpec((8, lane), lambda i: (0, 0)),    # packed biases / fw3 row
            ],
            out_specs=pl.BlockSpec((tb, 1), lambda i: (i, 0)),
        ),
        compiler_params=pltpu.CompilerParams(
            dimension_semantics=("parallel",),                # shards batch over v7x's 2 TCs
            vmem_limit_bytes=16 * 1024 * 1024,                # explicit; far above actual need
        ),
        cost_estimate=pl.CostEstimate(
            flops=flops, transcendentals=0, bytes_accessed=bytes_accessed),
    )(x, W1p, W2p, F1p, F2p, vecs)

    return out[:B, 0]                                         # [B]


# ----------------------------------------------------------------------------
# Pure-JAX reference (f32 everywhere, original unfused params)
# ----------------------------------------------------------------------------
def dmf_reference(Y, rating, params, sid, pid):
    (sw1, sb1, sw2, sb2,
     pw1, pb1, pw2, pb2,
     srw1, srb1, srw2, srb2,
     prw1, prb1, prw2, prb2,
     fw1, fb1, fw2, fb2, fw3, fb3) = params

    def mlp2(x, w1, b1, w2, b2):
        h = jnp.maximum(x @ w1 + b1, 0.0)
        return jnp.maximum(h @ w2 + b2, 0.0)

    p = mlp2(Y[sid, :], sw1, sb1, sw2, sb2)
    q = mlp2(Y[:, pid].T, pw1, pb1, pw2, pb2)
    sr = mlp2(rating[sid, :], srw1, srb1, srw2, srb2)
    pr = mlp2(rating[:, pid].T, prw1, prb1, prw2, prb2)
    z = jnp.concatenate([p, q, sr, pr], axis=1)
    h1 = jnp.maximum(z @ fw1 + fb1, 0.0)
    h2 = jnp.maximum(h1 @ fw2 + fb2, 0.0)
    return (h2 @ fw3 + fb3)[:, 0]


if __name__ == "__main__":
    num_scientists = 128
    num_papers = 128
    dim = 32
    hidden_dim = 32
    B = 32
    TB = 16

    key = jax.random.PRNGKey(0)
    k_y, k_r, k_p, k_s, k_pid = jax.random.split(key, 5)

    Y = jax.random.normal(k_y, (num_scientists, num_papers), jnp.float32)
    rating = jax.random.normal(k_r, (num_scientists, num_papers), jnp.float32)
    params = make_params(k_p, num_scientists, num_papers, dim, hidden_dim)
    fused = pack_fused_params(params)

    # Transposes precomputed once (off the per-call hot path).
    Y_T = jnp.asarray(Y.T)
    rating_T = jnp.asarray(rating.T)

    sid = jax.random.randint(k_s, (B,), 0, num_scientists, jnp.int32)
    pid = jax.random.randint(k_pid, (B,), 0, num_papers, jnp.int32)

    out = jax.block_until_ready(
        dmf_forward(Y, Y_T, rating, rating_T, fused, sid, pid, tb=TB))
    ref = jax.block_until_ready(dmf_reference(Y, rating, params, sid, pid))

    assert out.shape == (B,)
    # bf16 MXU operands (f32 accumulation) introduce ~1e-3..1e-2 relative error
    # vs. the pure-f32 reference, hence the loosened tolerance.
    np.testing.assert_allclose(np.asarray(out), np.asarray(ref), rtol=5e-2, atol=5e-2)
    print("KERNEL_OK")
</pallas_src>

<mosaic_0001>
module attributes {stable_mosaic.version = 11 : i64} {
  func.func @dmf_kernel(%arg0: i32, %arg1: memref<16x512xbf16, #tpu.memory_space<vmem>>, %arg2: memref<512x128xbf16, #tpu.memory_space<vmem>>, %arg3: memref<128x128xbf16, #tpu.memory_space<vmem>>, %arg4: memref<128x128xbf16, #tpu.memory_space<vmem>>, %arg5: memref<128x128xbf16, #tpu.memory_space<vmem>>, %arg6: memref<8x128xf32, #tpu.memory_space<vmem>>, %arg7: memref<16x1xf32, #tpu.memory_space<vmem>>) attributes {dimension_semantics = [#tpu.dimension_semantics<parallel>], iteration_bounds = array<i64: 2>, scalar_prefetch = 0 : i64, scratch_operands = 0 : i64, tpu.core_type = #tpu.core_type<tc>, window_params = [{transform_indices = @transform_0, window_bounds = array<i64: 16, 512>}, {pipeline_mode = #tpu.pipeline_mode<synchronous>, transform_indices = @transform_1, window_bounds = array<i64: 512, 128>}, {pipeline_mode = #tpu.pipeline_mode<synchronous>, transform_indices = @transform_2, window_bounds = array<i64: 128, 128>}, {pipeline_mode = #tpu.pipeline_mode<synchronous>, transform_indices = @transform_3, window_bounds = array<i64: 128, 128>}, {pipeline_mode = #tpu.pipeline_mode<synchronous>, transform_indices = @transform_4, window_bounds = array<i64: 128, 128>}, {pipeline_mode = #tpu.pipeline_mode<synchronous>, transform_indices = @transform_5, window_bounds = array<i64: 8, 128>}, {transform_indices = @transform_6, window_bounds = array<i64: 16, 1>}]} {
    %c0 = arith.constant 0 : index
    %c0_0 = arith.constant 0 : index
    %0 = vector.load %arg1[%c0, %c0_0] : memref<16x512xbf16, #tpu.memory_space<vmem>>, vector<16x512xbf16>
    %c0_1 = arith.constant 0 : index
    %c0_2 = arith.constant 0 : index
    %1 = vector.load %arg2[%c0_1, %c0_2] : memref<512x128xbf16, #tpu.memory_space<vmem>>, vector<512x128xbf16>
    %cst = arith.constant dense<0.000000e+00> : vector<16x128xf32>
    %2 = tpu.matmul %0, %1, %cst {dimension_numbers = #tpu.dot_dimension_numbers<[1], [0], [0], [1], [0, 0, 1, 1], [], []>} : vector<16x512xbf16>, vector<512x128xbf16>, vector<16x128xf32> -> vector<16x128xf32>
    %c0_3 = arith.constant 0 : index
    %c0_4 = arith.constant 0 : index
    %3 = vector.load %arg6[%c0_3, %c0_4] : memref<8x128xf32, #tpu.memory_space<vmem>>, vector<1x128xf32>
    %4 = vector.broadcast %3 : vector<1x128xf32> to vector<16x128xf32>
    %5 = arith.addf %2, %4 : vector<16x128xf32>
    %cst_5 = arith.constant 0.000000e+00 : f32
    %6 = vector.broadcast %cst_5 : f32 to vector<16x128xf32>
    %7 = arith.maximumf %5, %6 : vector<16x128xf32>
    %8 = arith.truncf %7 : vector<16x128xf32> to vector<16x128xbf16>
    %c0_6 = arith.constant 0 : index
    %c0_7 = arith.constant 0 : index
    %9 = vector.load %arg3[%c0_6, %c0_7] : memref<128x128xbf16, #tpu.memory_space<vmem>>, vector<128x128xbf16>
    %cst_8 = arith.constant dense<0.000000e+00> : vector<16x128xf32>
    %10 = tpu.matmul %8, %9, %cst_8 {dimension_numbers = #tpu.dot_dimension_numbers<[1], [0], [0], [1], [0, 0, 1, 1], [], []>} : vector<16x128xbf16>, vector<128x128xbf16>, vector<16x128xf32> -> vector<16x128xf32>
    %c1 = arith.constant 1 : index
    %c0_9 = arith.constant 0 : index
    %11 = vector.load %arg6[%c1, %c0_9] : memref<8x128xf32, #tpu.memory_space<vmem>>, vector<1x128xf32>
    %12 = vector.broadcast %11 : vector<1x128xf32> to vector<16x128xf32>
    %13 = arith.addf %10, %12 : vector<16x128xf32>
    %cst_10 = arith.constant 0.000000e+00 : f32
    %14 = vector.broadcast %cst_10 : f32 to vector<16x128xf32>
    %15 = arith.maximumf %13, %14 : vector<16x128xf32>
    %16 = arith.truncf %15 : vector<16x128xf32> to vector<16x128xbf16>
    %c0_11 = arith.constant 0 : index
    %c0_12 = arith.constant 0 : index
    %17 = vector.load %arg4[%c0_11, %c0_12] : memref<128x128xbf16, #tpu.memory_space<vmem>>, vector<128x128xbf16>
    %cst_13 = arith.constant dense<0.000000e+00> : vector<16x128xf32>
    %18 = tpu.matmul %16, %17, %cst_13 {dimension_numbers = #tpu.dot_dimension_numbers<[1], [0], [0], [1], [0, 0, 1, 1], [], []>} : vector<16x128xbf16>, vector<128x128xbf16>, vector<16x128xf32> -> vector<16x128xf32>
    %c2 = arith.constant 2 : index
    %c0_14 = arith.constant 0 : index
    %19 = vector.load %arg6[%c2, %c0_14] : memref<8x128xf32, #tpu.memory_space<vmem>>, vector<1x128xf32>
    %20 = vector.broadcast %19 : vector<1x128xf32> to vector<16x128xf32>
    %21 = arith.addf %18, %20 : vector<16x128xf32>
    %cst_15 = arith.constant 0.000000e+00 : f32
    %22 = vector.broadcast %cst_15 : f32 to vector<16x128xf32>
    %23 = arith.maximumf %21, %22 : vector<16x128xf32>
    %24 = arith.truncf %23 : vector<16x128xf32> to vector<16x128xbf16>
    %c0_16 = arith.constant 0 : index
    %c0_17 = arith.constant 0 : index
    %25 = vector.load %arg5[%c0_16, %c0_17] : memref<128x128xbf16, #tpu.memory_space<vmem>>, vector<128x128xbf16>
    %cst_18 = arith.constant dense<0.000000e+00> : vector<16x128xf32>
    %26 = tpu.matmul %24, %25, %cst_18 {dimension_numbers = #tpu.dot_dimension_numbers<[1], [0], [0], [1], [0, 0, 1, 1], [], []>} : vector<16x128xbf16>, vector<128x128xbf16>, vector<16x128xf32> -> vector<16x128xf32>
    %c3 = arith.constant 3 : index
    %c0_19 = arith.constant 0 : index
    %27 = vector.load %arg6[%c3, %c0_19] : memref<8x128xf32, #tpu.memory_space<vmem>>, vector<1x128xf32>
    %28 = vector.broadcast %27 : vector<1x128xf32> to vector<16x128xf32>
    %29 = arith.addf %26, %28 : vector<16x128xf32>
    %cst_20 = arith.constant 0.000000e+00 : f32
    %30 = vector.broadcast %cst_20 : f32 to vector<16x128xf32>
    %31 = arith.maximumf %29, %30 : vector<16x128xf32>
    %c4 = arith.constant 4 : index
    %c0_21 = arith.constant 0 : index
    %32 = vector.load %arg6[%c4, %c0_21] : memref<8x128xf32, #tpu.memory_space<vmem>>, vector<1x128xf32>
    %33 = vector.broadcast %32 : vector<1x128xf32> to vector<16x128xf32>
    %34 = arith.mulf %31, %33 : vector<16x128xf32>
    %cst_22 = arith.constant dense<0.000000e+00> : vector<16xf32>
    %35 = vector.multi_reduction <add>, %34, %cst_22 [1] : vector<16x128xf32> to vector<16xf32>
    %36 = vector.shape_cast %35 : vector<16xf32> to vector<16x1xf32>
    %c5 = arith.constant 5 : index
    %c0_23 = arith.constant 0 : index
    %37 = vector.load %arg6[%c5, %c0_23] : memref<8x128xf32, #tpu.memory_space<vmem>>, vector<1x1xf32>
    %38 = vector.broadcast %37 : vector<1x1xf32> to vector<16x1xf32>
    %39 = arith.addf %36, %38 : vector<16x1xf32>
    %c0_24 = arith.constant 0 : index
    %c0_25 = arith.constant 0 : index
    %40 = vector.load %arg7[%c0_24, %c0_25] : memref<16x1xf32, #tpu.memory_space<vmem>>, vector<16x1xf32>
    tpu.vector_store %arg7[%c0_24, %c0_25], %39 {strides = array<i32>} : memref<16x1xf32, #tpu.memory_space<vmem>>, vector<16x1xf32>,
    return
  }
  func.func @transform_0(%arg0: i32) -> (i32, i32) {
    %c0_i32 = arith.constant 0 : i32
    %c0_i32_0 = arith.constant 0 : i32
    return %arg0, %c0_i32 : i32, i32
  }
  func.func @transform_1(%arg0: i32) -> (i32, i32) {
    %c0_i32 = arith.constant 0 : i32
    %c0_i32_0 = arith.constant 0 : i32
    %c0_i32_1 = arith.constant 0 : i32
    return %c0_i32, %c0_i32_0 : i32, i32
  }
  func.func @transform_2(%arg0: i32) -> (i32, i32) {
    %c0_i32 = arith.constant 0 : i32
    %c0_i32_0 = arith.constant 0 : i32
    %c0_i32_1 = arith.constant 0 : i32
    return %c0_i32, %c0_i32_0 : i32, i32
  }
  func.func @transform_3(%arg0: i32) -> (i32, i32) {
    %c0_i32 = arith.constant 0 : i32
    %c0_i32_0 = arith.constant 0 : i32
    %c0_i32_1 = arith.constant 0 : i32
    return %c0_i32, %c0_i32_0 : i32, i32
  }
  func.func @transform_4(%arg0: i32) -> (i32, i32) {
    %c0_i32 = arith.constant 0 : i32
    %c0_i32_0 = arith.constant 0 : i32
    %c0_i32_1 = arith.constant 0 : i32
    return %c0_i32, %c0_i32_0 : i32, i32
  }
  func.func @transform_5(%arg0: i32) -> (i32, i32) {
    %c0_i32 = arith.constant 0 : i32
    %c0_i32_0 = arith.constant 0 : i32
    %c0_i32_1 = arith.constant 0 : i32
    return %c0_i32, %c0_i32_0 : i32, i32
  }
  func.func @transform_6(%arg0: i32) -> (i32, i32) {
    %c0_i32 = arith.constant 0 : i32
    %c0_i32_0 = arith.constant 0 : i32
    return %arg0, %c0_i32 : i32, i32
  }
}

</mosaic_0001>

<bundles_post_ra>
// kernel: tpu_custom_call.1
= control target key start
LH: loop header
LB: loop body
LE: loop exit
PB: predicated region body
PF: predicated region fallthrough
CT: control target
= control target key end

     0   :  { %11 = vsyncpa [#allocation3], 0  ;;  %s2063_s0 = inlined_call_operand.hbm [shape: bf16[32,512], index: 0, kind: input, shape index: {}]   ;;  %s2064_s1 = inlined_call_operand.hbm [shape: bf16[512,128], index: 1, kind: input, shape index: {}]   ;;  %s2065_s2 = inlined_call_operand.hbm [shape: bf16[128,128], index: 2, kind: input, shape index: {}]   ;;  %s2066_s3 = inlined_call_operand.hbm [shape: bf16[128,128], index: 3, kind: input, shape index: {}]   ;;  %s2067_s4 = inlined_call_operand.hbm [shape: bf16[128,128], index: 4, kind: input, shape index: {}]   ;;  %s2068_s5 = inlined_call_operand.vmem [shape: f32[8,128], index: 5, kind: input, shape index: {}]   ;;  %s2069_s6 = inlined_call_operand.vmem [shape: f32[32,1], index: 6, kind: output, shape index: {}]  }
   0x1   :  { %13 = vsyncpa [#allocation3 + $0x1], 0 }
   0x2   :  { %14 = vsyncpa [#allocation5], 0 }
   0x3   :  { %15 = vsyncpa [#allocation8], 0  ;;  %s1769_s21 = smov 0   ;;  %s1771_s22 = smov 0  }
   0x4   :  { %s1773_s23 = smov 0   ;;  %s1775_s24 = smov 0  }
   0x5 LB: > { %s1168_s25 = sadd.s32 4294967295, %s1721_s24   ;;  %p41_p0 = scmp.ne.s32.totalorder %s1713_s22, %s1709_s21  ;;  %s1721_s24 = sphi %s1775_s24, %s2086_s24   ;;  %s1717_s23 = sphi %s1773_s23, %s2085_s23   ;;  %s1713_s22 = sphi %s1771_s22, %s2084_s22   ;;  %s1709_s21 = sphi %s1769_s21, %s2083_s21  }
   0x6   : > { %p1791_p1 = scmp.eq.s32.totalorder %s1168_s25, 0  ;;  %p1170_p2 = scmp.ge.s32.totalorder %s1721_s24, 1 }
   0x7   : > { %p183_p3 = scmp.lt.s32.totalorder %s1721_s24, 3  ;;  %s1723_s29 = smov [#allocation4]  }
   0x8   : > { %s2074_s26 = scalar_select %p1791_p1, 1, 0 }
   0x9   : > { %p1799_p4 = por %p1791_p1, %p41_p0  ;;  %p1803_p5 = pnand %p1170_p2, %p183_p3 }
   0xa   : > { %s195_s30 = sshll.u32 %s1723_s29, 4  ;;  %s1724_s8 = smov [#allocation7]   ;;  %s1807_s30 = int_to_ptr.vmem [resolvable:$true] %s195_s30 }
   0xb   : > { %s2075_s27 = scalar_select %p1799_p4, 1, 0 }
   0xc   : > { %s2076_s28 = scalar_select %p1803_p5, 1, 0 }
   0xd   : > { %p1407_p6 = pneg %p1803_p5  ;;  %s221_s9 = sshll.u32 %s1724_s8, 4  ;;  %s1817_s9 = int_to_ptr.vmem [resolvable:$true] %s221_s9 }
   0xe   : > { %s1725_s10 = smov [#allocation6]   ;;  %s1537_s14 = scalar_lea.hbm %s2064_s1, 4096 }
   0xf   : > { %p1813_p7 = pnand %p1407_p6, %p1791_p1  ;;  %s1819_s11 = sshll.u32 %s1725_s10, 4  ;;  %s209_s11 = int_to_ptr.vmem [resolvable:$true] %s1819_s11 }
  0x10   : > { %p1538_p8 = scmp.ne.s32.totalorder %s2064_s1, %s1537_s14  ;;  %p1544_p12 = scmp.lt.u32.totalorder %s1537_s14, %s2064_s1 }
  0x11   : > { %p1829_p9 = pneg %p1813_p7 }
  0x13   : > { %p1540_p10 = pnand %p1829_p9, %p1538_p8 }
  0x15   : > { %p1541_p11 = pneg %p1540_p10 }
  0x17   : > { %p1546_p13 = pnand %p1544_p12, %p1541_p11 }
  0x19   : > { %1549 = shalt.err (!%p1546_p13)
}
  0x1a   : > { %s1550_s20 = scalar_lea.vmem %s1807_s30, 4096  ;;  %p1558_p6 = scmp.lt.s32.totalorder %s1807_s30, %s1807_s30 }
  0x1b   : > { %p1551_p0 = scmp.ne.s32.totalorder %s1807_s30, %s1550_s20  ;;  %p1559_p1 = scmp.lt.s32.totalorder %s1550_s20, %s1550_s20 }
  0x1d   : > { %p1553_p2 = pnand %p1551_p0, %p1829_p9  ;;  %p1560_p8 = por %p1559_p1, %p1558_p6 }
  0x1f   : > { %p1554_p3 = pneg %p1553_p2 }
  0x21   : > { %p1561_p10 = pnand %p1560_p8, %p1554_p3 }
  0x23   : > { %1564 = shalt.err (!%p1561_p10)
}
  0x24   : > { %s1726_s21 = smov 64   ;;  %s1727_s29 = smov 4  }
  0x25   : > { %1410 = dma.hbm_to_vmem [thread:$0]  (!%p1813_p7), %s2064_s1, 4096, %s1807_s30, [#allocation5], %s1726_s21, %s1726_s21, %s1727_s29  }
  0x26   : > { %s1565_s14 = scalar_lea.hbm %s2066_s3, 1024 }
  0x27   : > { %p1566_p1 = scmp.ne.s32.totalorder %s2066_s3, %s1565_s14  ;;  %p1572_p13 = scmp.lt.u32.totalorder %s1565_s14, %s2066_s3 }
  0x29   : > { %p1568_p11 = pnand %p1566_p1, %p1829_p9 }
  0x2b   : > { %p1569_p12 = pneg %p1568_p11 }
  0x2d   : > { %p1574_p0 = pnand %p1572_p13, %p1569_p12 }
  0x2f   : > { %1577 = shalt.err (!%p1574_p0)
}
  0x30   : > { %s1578_s30 = scalar_lea.vmem %s1817_s9, 1024  ;;  %p1586_p8 = scmp.lt.s32.totalorder %s1817_s9, %s1817_s9 }
  0x31   : > { %p1579_p2 = scmp.ne.s32.totalorder %s1817_s9, %s1578_s30  ;;  %p1587_p10 = scmp.lt.s32.totalorder %s1578_s30, %s1578_s30 }
  0x33   : > { %p1581_p3 = pnand %p1579_p2, %p1829_p9  ;;  %p1588_p1 = por %p1587_p10, %p1586_p8 }
  0x35   : > { %p1582_p6 = pneg %p1581_p3 }
  0x37   : > { %p1589_p11 = pnand %p1588_p1, %p1582_p6 }
  0x39   : > { %1592 = shalt.err (!%p1589_p11)
}
  0x3a   : > { %1416 = dma.hbm_to_vmem [thread:$0]  (!%p1813_p7), %s2066_s3, 1024, %s1817_s9, [#allocation8], %s1726_s21, %s1726_s21, %s1727_s29  }
  0x3b   : > { %s1593_s13 = scalar_lea.hbm %s2065_s2, 1024 }
  0x3c   : > { %p1594_p12 = scmp.ne.s32.totalorder %s2065_s2, %s1593_s13  ;;  %p1600_p2 = scmp.lt.u32.totalorder %s1593_s13, %s2065_s2 }
  0x3e   : > { %p1596_p13 = pnand %p1594_p12, %p1829_p9 }
  0x40   : > { %p1597_p0 = pneg %p1596_p13 }
  0x42   : > { %p1602_p3 = pnand %p1600_p2, %p1597_p0 }
  0x44   : > { %1605 = shalt.err (!%p1602_p3)
}
  0x45   : > { %s1606_s19 = scalar_lea.vmem %s209_s11, 1024  ;;  %p1614_p1 = scmp.lt.s32.totalorder %s209_s11, %s209_s11 }
  0x46   : > { %p1607_p6 = scmp.ne.s32.totalorder %s209_s11, %s1606_s19  ;;  %p1615_p11 = scmp.lt.s32.totalorder %s1606_s19, %s1606_s19 }
  0x48   : > { %p1609_p8 = pnand %p1607_p6, %p1829_p9  ;;  %p1616_p4 = por %p1615_p11, %p1614_p1 }
  0x4a   : > { %p1610_p10 = pneg %p1609_p8 }
  0x4c   : > { %p1617_p5 = pnand %p1616_p4, %p1610_p10 }
  0x4e   : > { %1620 = shalt.err (!%p1617_p5)
}
  0x4f   : > { %1413 = dma.hbm_to_vmem [thread:$0]  (!%p1813_p7), %s2065_s2, 1024, %s209_s11, [#allocation5], %s1726_s21, %s1726_s21, %s1727_s29  }
  0x50   : > { %s1728_s20 = smov [#allocation9]   ;;  %s1621_s13 = scalar_lea.hbm %s2067_s4, 1024 }
  0x51   : > { %s234_s8 = sshll.u32 %s1728_s20, 4  ;;  %p1622_p4 = scmp.ne.s32.totalorder %s2067_s4, %s1621_s13  ;;  %s235_s8 = int_to_ptr.vmem [resolvable:$true] %s234_s8 }
  0x52   : > { %p1628_p13 = scmp.lt.u32.totalorder %s1621_s13, %s2067_s4 }
  0x53   : > { %p1624_p5 = pnand %p1622_p4, %p1829_p9 }
  0x55   : > { %p1625_p12 = pneg %p1624_p5 }
  0x57   : > { %p1630_p0 = pnand %p1628_p13, %p1625_p12 }
  0x59   : > { %1633 = shalt.err (!%p1630_p0)
}
  0x5a   : > { %s1634_s11 = scalar_lea.vmem %s235_s8, 1024  ;;  %p1642_p8 = scmp.lt.s32.totalorder %s235_s8, %s235_s8 }
  0x5b   : > { %p1635_p2 = scmp.ne.s32.totalorder %s235_s8, %s1634_s11  ;;  %p1643_p10 = scmp.lt.s32.totalorder %s1634_s11, %s1634_s11 }
  0x5d   : > { %p1637_p3 = pnand %p1635_p2, %p1829_p9  ;;  %p1644_p1 = por %p1643_p10, %p1642_p8 }
  0x5f   : > { %p1638_p6 = pneg %p1637_p3 }
  0x61   : > { %p1645_p11 = pnand %p1644_p1, %p1638_p6 }
  0x63   : > { %1648 = shalt.err (!%p1645_p11)
}
  0x64   : > { %1419 = dma.hbm_to_vmem [thread:$0]  (!%p1813_p7), %s2067_s4, 1024, %s235_s8, [#allocation8], %s1726_s21, %s1726_s21, %s1727_s29  }
  0x65   : > { %s1923_s17 = sadd.s32 1, %s1721_s24   ;;  %s28_s7 = sadd.s32 1, %s1717_s23 }
  0x66   : > { %s25_s30 = ssub.s32 %s1721_s24, %s1923_s17  ;;  %p35_p9 = scmp.ne.s32.totalorder %s1717_s23, %s1713_s22 }
  0x67   : > { %p26_p4 = scmp.eq.s32.totalorder %s25_s30, 0  ;;  %p36_p5 = scmp.eq.s32.totalorder %s1721_s24, 0 }
  0x68   : > { %p1428_p12 = scmp.lt.s32.totalorder %s1721_s24, 2  ;;  %s251_s20 = sand.u32 1, %s1717_s23  }
  0x69   : > { %s1934_s10 = scalar_select %p26_p4, %s1717_s23, %s28_s7  }
  0x6a   : > { %p37_p13 = por %p36_p5, %p35_p9  ;;  %s1176_s12 = sshll.u32 %s251_s20, 5 }
  0x6b   : > { %s1257_s13 = sshll.u32 %s1721_s24, 9  ;;  %s255_s21 = scalar_lea.vmem [#allocation2], %s1176_s12 }
  0x6c   : > { %s1940_s16 = scalar_lea.hbm %s2063_s0, %s1257_s13  ;;  %s263_s29 = sshll.u32 %s255_s21, 4  ;;  %s1946_s29 = int_to_ptr.vmem [resolvable:$true] %s263_s29 }
  0x6d   : > { %p1942_p7 = pnand %p1428_p12, %p37_p13  ;;  %s1948_s18 = scalar_lea.sflag [#allocation3], %s251_s20 }
  0x6e   : > { %s1649_s11 = scalar_lea.hbm %s1940_s16, 512  ;;  %s1654_s7 = scalar_lea.hbm %s2063_s0, 1024 }
  0x6f   : > { %p1650_p0 = scmp.ne.s32.totalorder %s1940_s16, %s1649_s11  ;;  %p1651_p2 = pneg %p1942_p7 }
  0x70   : > { %p1655_p8 = scmp.lt.u32.totalorder %s1940_s16, %s2063_s0  ;;  %p1656_p10 = scmp.lt.u32.totalorder %s1654_s7, %s1649_s11 }
  0x71   : > { %p1652_p3 = pnand %p1651_p2, %p1650_p0  ;;  %p1658_p11 = scmp.lt.u32.totalorder %s1649_s11, %s1940_s16 }
  0x72   : > { %p1657_p1 = por %p1656_p10, %p1655_p8 }
  0x73   : > { %p1653_p6 = pneg %p1652_p3 }
  0x74   : > { %p1659_p9 = por %p1658_p11, %p1657_p1 }
  0x76   : > { %p1660_p4 = pnand %p1659_p9, %p1653_p6 }
  0x78   : > { %1663 = shalt.err (!%p1660_p4)
}
  0x79   : > { %s1664_s20 = scalar_lea.vmem %s1946_s29, 512  ;;  %s1729_s13 = smov [#allocation2]  }
  0x7a   : > { %p1665_p5 = scmp.ne.s32.totalorder %s1946_s29, %s1664_s20  ;;  %s1669_s14 = sshll.u32 %s1729_s13, 4  ;;  %s1670_s14 = int_to_ptr.vmem [resolvable:$false] %s1669_s14 }
  0x7b   : > { %s1671_s15 = scalar_lea.vmem %s1670_s14, 1024  ;;  %p1672_p0 = scmp.lt.s32.totalorder %s1946_s29, %s1670_s14 }
  0x7c   : > { %p1667_p12 = pnand %p1665_p5, %p1651_p2  ;;  %p1673_p3 = scmp.lt.s32.totalorder %s1671_s15, %s1664_s20 }
  0x7e   : > { %p1668_p13 = pneg %p1667_p12  ;;  %p1674_p8 = por %p1673_p3, %p1672_p0 }
  0x80   : > { %p1675_p10 = pnand %p1674_p8, %p1668_p13 }
  0x82   : > { %1678 = shalt.err (!%p1675_p10)
}
  0x83   : > { %s1730_s21 = smov 256   ;;  %s1731_s11 = smov 16  }
  0x84   : > { %1423 = dma.hbm_to_vmem [thread:$0]  (!%p1942_p7), %s1940_s16, 512, %s1946_s29, %s1948_s18, %s1730_s21, %s1730_s21, %s1731_s11  }
  0x85   : > { %p2080_p2 = scmp.ne.s32.totalorder %s2076_s28, 0 }
  0x86   : > { %s277_s19 = sand.u32 (!%p2080_p2), 1, %s1713_s22   ;;  %p2081_p6 = scmp.ne.s32.totalorder (!%p2080_p2), %s2075_s27, 0 }
  0x87   : > { %275 = sbr.rel (%p2080_p2) target bundleno = 1214 (0x4be), region = 44  ;;  %s1181_s9 = sshll.u32 (!%p2080_p2), %s277_s19, 5 }
  0x88   : > { %s278_s7 = scalar_lea.sflag (!%p2080_p2), [#allocation3], %s277_s19  ;;  %s1979_s30 = scalar_lea.vmem (!%p2080_p2), [#allocation2], %s1181_s9 }
  0x8e   : > { %1696 = dma.done.wait (%p2081_p6), %s278_s7, 512  }
  0x8f   : > { %1698 = vsyncadd (%p2081_p6), %s278_s7, 4294966784  ;;  %p2082_p1 = scmp.ne.s32.totalorder %s2074_s26, 0 }
  0x91   : > { %1700 = dma.done.wait (%p2082_p1), [#allocation5], 5120  }
  0x92   : > { %1702 = vsyncadd (%p2082_p1), [#allocation5], 4294962176 }
  0x93   : > { %1704 = dma.done.wait (%p2082_p1), [#allocation8], 2048  }
  0x94   : > { %1706 = vsyncadd (%p2082_p1), [#allocation8], 4294965248  ;;  %v1475_v0 = vld [vmem:[#allocation4 + $0x40] sm:$0xff]   ;;  %v1479_v4 = vld [vmem:[#allocation4 + $0x48] sm:$0xff]   ;;  %v1732_v34 = vmov 0.0   ;;  %vm1733_vm0 = vmmov 0  }
  0x95   : > { %v1476_v1 = vld [vmem:[#allocation4 + $0xc0] sm:$0xff]   ;;  %1258 = vmatprep.subr.bf16.mxu0 %v1475_v0  ;;  %v1480_v5 = vld [vmem:[#allocation4 + $0xc8] sm:$0xff]   ;;  %v1483_v8 = vld [vmem:[#allocation4 + $0x50] sm:$0xff]   ;;  %s1186_s14 = sshll.u32 %s1168_s25, 1  ;;  %vm1060_vm1 = vcmask 7168  }
  0x96   : > { %v1477_v2 = vld [vmem:[#allocation4] sm:$0xff]   ;;  %1280 = vmatprep.subr.bf16.mxu1 %v1476_v1  ;;  %v1481_v6 = vld [vmem:[#allocation4 + $0x8] sm:$0xff]   ;;  %v1484_v9 = vld [vmem:[#allocation4 + $0xd0] sm:$0xff]   ;;  %p328_p7 = scmp.lt.s32.totalorder %s1186_s14, 3 }
  0x97   : > { %v1478_v3 = vld [vmem:[#allocation4 + $0x80] sm:$0xff]   ;;  %1259 = vmatpush3.bf16.msra.mxu0 %v1477_v2  ;;  %v1482_v7 = vld [vmem:[#allocation4 + $0x88] sm:$0xff]   ;;  %v1485_v10 = vld [vmem:[#allocation4 + $0x10] sm:$0xff]  }
  0x98   : > { %1281 = vmatpush3.bf16.msra.mxu1 %v1478_v3  ;;  %1260 = vmatprep.subr.bf16.mxu0 %v1479_v4  ;;  %v1486_v11 = vld [vmem:[#allocation4 + $0x90] sm:$0xff]   ;;  %v1487_v12 = vld [vmem:[#allocation4 + $0x58] sm:$0xff]   ;;  %v1491_v16 = vld [vmem:[#allocation4 + $0x60] sm:$0xff]   ;;  %s2088_s14 = smov (!%p328_p7, %s1186_s14), 3 }
  0x99   : > { %1282 = vmatprep.subr.bf16.mxu1 %v1480_v5  ;;  %v1488_v13 = vld [vmem:[#allocation4 + $0xd8] sm:$0xff]   ;;  %v1492_v17 = vld [vmem:[#allocation4 + $0xe0] sm:$0xff]   ;;  %v1495_v20 = vld [vmem:[#allocation4 + $0x68] sm:$0xff]   ;;  %s1187_s15 = sshll.u32 %s2088_s14, 3 }
  0x9a   : > { %v1489_v14 = vld [vmem:[#allocation4 + $0x18] sm:$0xff]   ;;  %v1493_v18 = vld [vmem:[#allocation4 + $0x20] sm:$0xff]   ;;  %v1496_v21 = vld [vmem:[#allocation4 + $0xe8] sm:$0xff]   ;;  %s331_s7 = scalar_lea.vmem %s2069_s6, %s1187_s15 }
  0x9b   : > { %1261 = vmatpush3.bf16.msra.mxu0 %v1481_v6  ;;  %v1490_v15 = vld [vmem:[#allocation4 + $0x98] sm:$0xff]   ;;  %v1494_v19 = vld [vmem:[#allocation4 + $0xa0] sm:$0xff]   ;;  %v1497_v22 = vld [vmem:[#allocation4 + $0x28] sm:$0xff]  }
  0x9c   : > { %1283 = vmatpush3.bf16.msra.mxu1 %v1482_v7  ;;  %1262 = vmatprep.subr.bf16.mxu0 %v1483_v8  ;;  %v1498_v23 = vld [vmem:[#allocation4 + $0xa8] sm:$0xff]   ;;  %v1499_v24 = vld [vmem:[#allocation4 + $0x70] sm:$0xff]   ;;  %v1503_v28 = vld [vmem:[#allocation4 + $0x78] sm:$0xff]  }
  0x9d   : > { %1284 = vmatprep.subr.bf16.mxu1 %v1484_v9  ;;  %v1500_v25 = vld [vmem:[#allocation4 + $0xf0] sm:$0xff]   ;;  %v1504_v29 = vld [vmem:[#allocation4 + $0xf8] sm:$0xff]   ;;  %v1513_v37 = vld [vmem:[#allocation6] sm:$0xff]  }
  0x9e   : > { %v1501_v26 = vld [vmem:[#allocation4 + $0x30] sm:$0xff]   ;;  %v1505_v30 = vld [vmem:[#allocation4 + $0x38] sm:$0xff]   ;;  %v1514_v38 = vld [vmem:[#allocation6 + $0x8] sm:$0xff]  }
  0x9f   : > { %1263 = vmatpush3.bf16.msra.mxu0 %v1485_v10  ;;  %v1502_v27 = vld [vmem:[#allocation4 + $0xb0] sm:$0xff]   ;;  %v1506_v31 = vld [vmem:[#allocation4 + $0xb8] sm:$0xff]   ;;  %v1517_v41 = vld [vmem:[#allocation6 + $0x20] sm:$0xff]  }
  0xa0   : > { %1285 = vmatpush3.bf16.msra.mxu1 %v1486_v11  ;;  %1264 = vmatprep.subr.bf16.mxu0 %v1487_v12  ;;  %v1507_v32 = vld [vmem:[%s1979_s30] ss:$16 sps:$4 sm:$0xff]   ;;  %v1509_v33 = vld [vmem:[%s1979_s30 + $0x4] ss:$16 sps:$4 sm:$0xff]   ;;  %v1510_v35 = vld [vmem:[%s1979_s30 + $0x8] ss:$16 sps:$4 sm:$0xff]  }
  0xa1   : > { %1286 = vmatprep.subr.bf16.mxu1 %v1488_v13  ;;  %v1512_v36 = vld [vmem:[%s1979_s30 + $0xc] ss:$16 sps:$4 sm:$0xff]   ;;  %651 = vmatprep.mubr.bf16.mxu0 %v1509_v33  ;;  %v1515_v39 = vld [vmem:[#allocation6 + $0x10] sm:$0xff]   ;;  %v1521_v45 = vld [vmem:[#allocation7] sm:$0xff]  }
  0xa2   : > { %692 = vmatprep.mubr.bf16.mxu1 %v1512_v36  ;;  %v1516_v40 = vld [vmem:[#allocation6 + $0x18] sm:$0xff]   ;;  %v1518_v42 = vld [vmem:[#allocation6 + $0x28] sm:$0xff]   ;;  %v1519_v43 = vld [vmem:[#allocation6 + $0x30] sm:$0xff]  }
  0xa3   : > { %1265 = vmatpush3.bf16.msra.mxu0 %v1489_v14  ;;  %v1520_v44 = vld [vmem:[#allocation6 + $0x38] sm:$0xff]   ;;  %v1522_v46 = vld [vmem:[#allocation7 + $0x8] sm:$0xff]   ;;  %v1523_v47 = vld [vmem:[#allocation7 + $0x10] sm:$0xff]  }
  0xa4   : > { %1287 = vmatpush3.bf16.msra.mxu1 %v1490_v15  ;;  %1266 = vmatprep.subr.bf16.mxu0 %v1491_v16  ;;  %v1524_v48 = vld [vmem:[#allocation7 + $0x18] sm:$0xff]   ;;  %v1525_v49 = vld [vmem:[#allocation7 + $0x20] sm:$0xff]   ;;  %v1526_v50 = vld [vmem:[#allocation7 + $0x28] sm:$0xff]  }
  0xa5   : > { %1288 = vmatprep.subr.bf16.mxu1 %v1492_v17  ;;  %v1188_v53 = vld [vmem:[%s2068_s5] ss:$0 sm:$0xff]  ;;  %v1527_v7 = vld [vmem:[#allocation7 + $0x30] sm:$0xff]   ;;  %v1528_v8 = vld [vmem:[#allocation7 + $0x38] sm:$0xff]  }
  0xa6   : > { %v1529_v9 = vld [vmem:[#allocation9] sm:$0xff]   ;;  %v1530_v10 = vld [vmem:[#allocation9 + $0x8] sm:$0xff]   ;;  %v1531_v11 = vld [vmem:[#allocation9 + $0x10] sm:$0xff]  }
  0xa7   : > { %1267 = vmatpush3.bf16.msra.mxu0 %v1493_v18  ;;  %v1532_v12 = vld [vmem:[#allocation9 + $0x18] sm:$0xff]   ;;  %v1533_v13 = vld [vmem:[#allocation9 + $0x20] sm:$0xff]   ;;  %v1534_v14 = vld [vmem:[#allocation9 + $0x28] sm:$0xff]  }
  0xa8   : > { %1289 = vmatpush3.bf16.msra.mxu1 %v1494_v19  ;;  %1268 = vmatprep.subr.bf16.mxu0 %v1495_v20  ;;  %v1225_v15 = vld [vmem:[%s2068_s5 + $0x1] ss:$0 sm:$0xff] }
  0xa9   : > { %1290 = vmatprep.subr.bf16.mxu1 %v1496_v21 }
  0xab   : > { %1269 = vmatpush3.bf16.msra.mxu0 %v1497_v22 }
  0xac   : > { %1291 = vmatpush3.bf16.msra.mxu1 %v1498_v23  ;;  %1270 = vmatprep.subr.bf16.mxu0 %v1499_v24 }
  0xad   : > { %1292 = vmatprep.subr.bf16.mxu1 %v1500_v25  ;;  %v1535_v25 = vld [vmem:[#allocation9 + $0x30] sm:$0xff]  }
  0xaf   : > { %1271 = vmatpush3.bf16.msra.mxu0 %v1501_v26  ;;  %v1536_v26 = vld [vmem:[#allocation9 + $0x38] sm:$0xff]  }
  0xb0   : > { %1293 = vmatpush3.bf16.msra.mxu1 %v1502_v27  ;;  %1272 = vmatprep.subr.bf16.mxu0 %v1503_v28  ;;  %v1234_v27 = vld [vmem:[%s2068_s5 + $0x2] ss:$0 sm:$0xff] }
  0xb1   : > { %1294 = vmatprep.subr.bf16.mxu1 %v1504_v29 }
  0xb3   : > { %1273 = vmatpush3.bf16.msra.mxu0 %v1505_v30 }
  0xb4   : > { %1295 = vmatpush3.bf16.msra.mxu1 %v1506_v31  ;;  %1329 = vmatprep.subr.bf16.mxu0 %v1732_v34 }
  0xb5   : > { %1349 = vmatprep.subr.bf16.mxu1 %v1732_v34 }
  0xb6   : > { %652 = vmatmul.mubr.bf16.vlgmr.msra.gmra.mrb[0].mxu0 %v1507_v32 }
  0xb7   : > { %693 = vmatmul.mubr.bf16.vlgmr.msra.gmra.mrb[0].mxu1 %v1510_v35  ;;  %1330 = vmatpush3.bf16.msra.mxu0 %v1513_v37 }
  0xb8   : > { %1331 = vmatprep.subr.bf16.mxu0 %v1732_v34  ;;  %1345 = vmatprep.mubr.msk.bf16.mxu0 %vm1733_vm0, %v1732_v34 }
  0xb9   : > { %1365 = vmatprep.mubr.msk.bf16.mxu1 %vm1733_vm0, %v1732_v34  ;;  %1350 = vmatpush3.bf16.msra.mxu1 %v1521_v45 }
  0xba   : > { %1351 = vmatprep.subr.bf16.mxu1 %v1732_v34 }
  0xbb   : > { %1332 = vmatpush3.bf16.msra.mxu0 %v1514_v38 }
  0xbc   : > { %1333 = vmatprep.subr.bf16.mxu0 %v1732_v34 }
  0xbd   : > { %1352 = vmatpush3.bf16.msra.mxu1 %v1522_v46 }
  0xbe   : > { %1353 = vmatprep.subr.bf16.mxu1 %v1732_v34 }
  0xbf   : > { %1334 = vmatpush3.bf16.msra.mxu0 %v1515_v39 }
  0xc0   : > { %1335 = vmatprep.subr.bf16.mxu0 %v1732_v34 }
  0xc1   : > { %1354 = vmatpush3.bf16.msra.mxu1 %v1523_v47 }
  0xc2   : > { %1355 = vmatprep.subr.bf16.mxu1 %v1732_v34 }
  0xc3   : > { %1336 = vmatpush3.bf16.msra.mxu0 %v1516_v40 }
  0xc4   : > { %1337 = vmatprep.subr.bf16.mxu0 %v1732_v34 }
  0xc5   : > { %1356 = vmatpush3.bf16.msra.mxu1 %v1524_v48 }
  0xc6   : > { %1357 = vmatprep.subr.bf16.mxu1 %v1732_v34 }
  0xc7   : > { %1338 = vmatpush3.bf16.msra.mxu0 %v1517_v41 }
  0xc8   : > { %1339 = vmatprep.subr.bf16.mxu0 %v1732_v34 }
  0xc9   : > { %1358 = vmatpush3.bf16.msra.mxu1 %v1525_v49  ;;  %v1253_v49 = vld [vmem:[%s2068_s5 + $0x5] ss:$0 sm:$0xff] }
  0xca   : > { %1359 = vmatprep.subr.bf16.mxu1 %v1732_v34 }
  0xcb   : > { %1340 = vmatpush3.bf16.msra.mxu0 %v1518_v42  ;;  %v1252_v42 = vld [vmem:[%s2068_s5 + $0x4] ss:$0 sm:$0xff] }
  0xcc   : > { %1341 = vmatprep.subr.bf16.mxu0 %v1732_v34 }
  0xcd   : > { %1360 = vmatpush3.bf16.msra.mxu1 %v1526_v50 }
  0xce   : > { %1361 = vmatprep.subr.bf16.mxu1 %v1732_v34 }
  0xcf   : > { %1342 = vmatpush3.bf16.msra.mxu0 %v1519_v43 }
  0xd0   : > { %1343 = vmatprep.subr.bf16.mxu0 %v1732_v34 }
  0xd1   : > { %1362 = vmatpush3.bf16.msra.mxu1 %v1527_v7 }
  0xd2   : > { %1363 = vmatprep.subr.bf16.mxu1 %v1732_v34 }
  0xd3   : > { %1344 = vmatpush3.bf16.msra.mxu0 %v1520_v44 }
  0xd4   : > { %1369 = vmatprep.subr.bf16.mxu0 %v1732_v34 }
  0xd5   : > { %1364 = vmatpush3.bf16.msra.mxu1 %v1528_v8 }
 0x189   : > { %v1274_v51 = vpop.f32.mrb[0].mxu0 }
 0x18a   : > { %v1296_v52 = vpop.f32.mrb[0].mxu1  ;;  %v1275_v54 = vpop.f32.mrb[1].mxu0 }
 0x18b   : > { %v1276_v55 = vadd.f32 %v1275_v54, %v1274_v51  ;;  %v1297_v56 = vpop.f32.mrb[1].mxu1  ;;  %v1277_v57 = vpop.f32.mrb[2].mxu0 }
 0x18c   : > { %v1298_v58 = vadd.f32 %v1297_v56, %v1296_v52  ;;  %v1299_v59 = vpop.f32.mrb[2].mxu1  ;;  %v1278_v60 = vpop.f32.mrb[3].mxu0 }
 0x18d   : > { %v654_v61 = vadd.f32 %v1276_v55, %v1188_v53  ;;  %v1279_v62 = vadd.f32 %v1278_v60, %v1277_v57  ;;  %v1300_v63 = vpop.f32.mrb[3].mxu1 }
 0x18e   : > { %v1301_v0 = vadd.f32 %v1300_v63, %v1299_v59 }
 0x18f   : > { %v695_v1 = vadd.f32 %v1298_v58, %v654_v61  ;;  %v657_v2 = vadd.f32 %v1279_v62, %v1188_v53 }
 0x191   : > { %v698_v3 = vadd.f32 %v1301_v0, %v657_v2  ;;  %v701_v4 = vmax.f32 %v695_v1, 0.0 }
 0x193   : > { %v702_v5 = vmax.f32 %v698_v3, 0.0 }
 0x195   : > { %v703_v6 = vpack.c.bf16 %v702_v5, %v701_v4 }
 0x197   : > { %1346 = vmatmul.mubr.bf16.vlgmr.msra.gmra.mrb[4].mxu0 %v703_v6 }
 0x198   : > { %1385 = vmatprep.mubr.msk.bf16.mxu0 %vm1733_vm0, %v1732_v34  ;;  %1370 = vmatpush3.bf16.msra.mxu0 %v1529_v9 }
 0x199   : > { %1371 = vmatprep.subr.bf16.mxu0 %v1732_v34 }
 0x19c   : > { %1372 = vmatpush3.bf16.msra.mxu0 %v1530_v10 }
 0x19d   : > { %1373 = vmatprep.subr.bf16.mxu0 %v1732_v34 }
 0x1a0   : > { %1374 = vmatpush3.bf16.msra.mxu0 %v1531_v11 }
 0x1a1   : > { %1375 = vmatprep.subr.bf16.mxu0 %v1732_v34 }
 0x1a4   : > { %1376 = vmatpush3.bf16.msra.mxu0 %v1532_v12 }
 0x1a5   : > { %1377 = vmatprep.subr.bf16.mxu0 %v1732_v34 }
 0x1a8   : > { %1378 = vmatpush3.bf16.msra.mxu0 %v1533_v13 }
 0x1a9   : > { %1379 = vmatprep.subr.bf16.mxu0 %v1732_v34 }
 0x1ac   : > { %1380 = vmatpush3.bf16.msra.mxu0 %v1534_v14 }
 0x1ad   : > { %1381 = vmatprep.subr.bf16.mxu0 %v1732_v34 }
 0x1b0   : > { %1382 = vmatpush3.bf16.msra.mxu0 %v1535_v25 }
 0x1b1   : > { %1383 = vmatprep.subr.bf16.mxu0 %v1732_v34  ;;  %v1243_v34 = vld [vmem:[%s2068_s5 + $0x3] ss:$0 sm:$0xff] }
 0x1b4   : > { %1384 = vmatpush3.bf16.msra.mxu0 %v1536_v26 }
 0x26a   : > { %v807_v16 = vpop.f32.mrb[4].mxu0 }
 0x26b   : > { %v808_v17 = vadd.f32 %v1225_v15, %v807_v16  ;;  %v1347_v18 = vpop.f32.mrb[5].mxu0 }
 0x26c   : > { %v810_v19 = vpop.f32.mrb[6].mxu0 }
 0x26d   : > { %v811_v20 = vadd.f32 %v1225_v15, %v810_v19  ;;  %v1348_v21 = vpop.f32.mrb[7].mxu0  ;;  %v814_v22 = vmax.f32 %v808_v17, 0.0 }
 0x26f   : > { %v815_v23 = vmax.f32 %v811_v20, 0.0 }
 0x271   : > { %v816_v24 = vpack.c.bf16 %v815_v23, %v814_v22 }
 0x273   : > { %1366 = vmatmul.mubr.bf16.vlgmr.msra.gmra.mrb[4].mxu1 %v816_v24 }
 0x346   : > { %v920_v28 = vpop.f32.mrb[4].mxu1 }
 0x347   : > { %v921_v29 = vadd.f32 %v1234_v27, %v920_v28  ;;  %v1367_v30 = vpop.f32.mrb[5].mxu1 }
 0x348   : > { %v923_v31 = vpop.f32.mrb[6].mxu1 }
 0x349   : > { %v924_v32 = vadd.f32 %v1234_v27, %v923_v31  ;;  %v1368_v33 = vpop.f32.mrb[7].mxu1  ;;  %v927_v35 = vmax.f32 %v921_v29, 0.0 }
 0x34b   : > { %v928_v36 = vmax.f32 %v924_v32, 0.0 }
 0x34d   : > { %v929_v37 = vpack.c.bf16 %v928_v36, %v927_v35 }
 0x34f   : > { %1386 = vmatmul.mubr.bf16.vlgmr.msra.gmra.mrb[8].mxu0 %v929_v37 }
 0x422   : > { %v1033_v38 = vpop.f32.mrb[8].mxu0 }
 0x423   : > { %v1034_v39 = vadd.f32 %v1243_v34, %v1033_v38  ;;  %v1387_v40 = vpop.f32.mrb[9].mxu0 }
 0x424   : > { %v1036_v41 = vpop.f32.mrb[10].mxu0 }
 0x425   : > { %v1040_v43 = vmax.f32 %v1034_v39, 0.0  ;;  %v1037_v44 = vadd.f32 %v1243_v34, %v1036_v41  ;;  %v1388_v45 = vpop.f32.mrb[11].mxu0 }
 0x427   : > { %v1041_v46 = vmax.f32 %v1037_v44, 0.0  ;;  %v1047_v47 = vmul.f32 %v1252_v42, %v1040_v43 }
 0x429   : > { %1049 = vadd.xlane.f32.xlu0 %v1047_v47  ;;  %v1048_v48 = vmul.f32 %v1252_v42, %v1041_v46 }
 0x42d   : > { %1051 = vadd.xlane.f32.xlu0 %v1048_v48 }
 0x4b6   : > { %v1050_v50 = vpop.xlane.xlu0 %1049 }
 0x4b7   : > { %v1058_v51 = vadd.f32 %v1253_v49, %v1050_v50 }
 0x4b9   : > { %1061 = vst.msk [vmem:[%s331_s7] sm:$0xff] %vm1060_vm1, %v1058_v51 }
 0x4ba   : > { %v1052_v52 = vpop.xlane.xlu0 %1051 }
 0x4bb   : > { %v1059_v53 = vadd.f32 %v1253_v49, %v1052_v52 }
 0x4bd   : > { %1062 = vst.msk [vmem:[%s331_s7 + $0x8] sm:$0xff] %vm1060_vm1, %v1059_v53 }
 0x4be PF: > { %p18_p11 = scmp.ge.s32.totalorder %s1923_s17, 4   ;;  %s2083_s21 = smov %s1713_s22 }
 0x4bf   : > { %s2084_s22 = smov %s1717_s23  ;;  %s2085_s23 = smov %s1934_s10 }
 0x4c0   : > { %s2086_s24 = smov %s1923_s17  ;;  %20 = sbr.rel (!%p18_p11) target bundleno = 5 (0x5), region = 100 }
 0x4c7   :  { %1085 = vsyncpa [#allocation3], 1 }
 0x4c8   :  { %1087 = vsyncpa [#allocation3 + $0x1], 1 }
 0x4c9   :  { %1088 = vsyncpa [#allocation5], 1 }
 0x4ca   :  { %1089 = vsyncpa [#allocation8], 1 }

</bundles_post_ra>
